<compile_context>
chip_gen: v7x
topology: tpu7x:2x2x1
jax: 0.10.0
libtpu: 0.0.40
codegen_flags: <defaults>
</compile_context>

<pallas_src>
import jax
import jax.numpy as jnp
from jax.experimental import pallas as pl
from jax.experimental.pallas import tpu as pltpu

IN_DIM = 600
HID_DIM = 200
HID_PAD = 256   # lane-aligned hidden width (zero padded)
OUT_DIM = 1


def _round_up(x, m):
    return (x + m - 1) // m * m


def edge_projector_kernel(x_ref, w1_ref, b1_ref, w2_ref, b2_ref, o_ref):
    # x_ref: (tm, 600) [f32 or bf16], w1_ref: (600, 256) [f32 or bf16],
    # b1_ref: (1, 256) f32, w2_ref: (1, 256) f32, b2_ref: (1, 1) f32, o_ref: (tm, 1)

    # Layer 1 on the MXU, always accumulating in f32.
    h = jnp.dot(x_ref[...], w1_ref[...], preferred_element_type=jnp.float32)
    # Bias + ReLU in f32 on the VPU (padded lanes stay exactly zero).
    h = jnp.maximum(h + b1_ref[...], 0.0)

    # Layer 2 (200 -> 1): VPU multiply + lane reduction instead of a 1-column MXU
    # matmul — uses VPU/XLU slots the first matmul leaves idle, skips the MXU drain.
    y = jnp.sum(h * w2_ref[...], axis=-1, keepdims=True) + b2_ref[...]

    o_ref[...] = y.astype(o_ref.dtype)


def edge_projector(x, w1, b1, w2, b2, *, tm=512, cast_bf16=False):
    """Fused Edge_Projector forward.

    x:  [N, 600]
    w1: [600, 200]  (PyTorch weight transposed)
    b1: [200] or [1, 200]
    w2: [200, 1]    (PyTorch weight transposed)
    b2: [1] or [1, 1]
    Returns [N, 1].
    """
    N, D = x.shape
    assert D == IN_DIM
    out_dtype = x.dtype

    # Large, 128-aligned batch tile; never larger than the (padded) batch itself.
    tm = max(128, min(int(tm), _round_up(N, 128)))
    tm = _round_up(tm, 128)
    n_pad = _round_up(N, tm)

    # Pad the batch with zero rows instead of asserting N % tm == 0.
    if n_pad != N:
        x = jnp.concatenate([x, jnp.zeros((n_pad - N, IN_DIM), x.dtype)], axis=0)

    # Zero-pad the hidden dimension 200 -> 256 (exact), W2 reshaped to a (1, 256) row.
    w1_p = jnp.zeros((IN_DIM, HID_PAD), jnp.float32).at[:, :HID_DIM].set(
        w1.astype(jnp.float32))
    b1_p = jnp.zeros((1, HID_PAD), jnp.float32).at[:, :HID_DIM].set(
        jnp.reshape(b1, (1, HID_DIM)).astype(jnp.float32))
    w2_row = jnp.zeros((1, HID_PAD), jnp.float32).at[:, :HID_DIM].set(
        jnp.reshape(w2, (1, HID_DIM)).astype(jnp.float32))
    b2_p = jnp.reshape(b2, (1, 1)).astype(jnp.float32)

    if cast_bf16:
        # Halves HBM traffic for the streaming x tiles and uses the native bf16 MXU
        # rate; accumulation and all VPU math stay f32 inside the kernel.
        x = x.astype(jnp.bfloat16)
        w1_p = w1_p.astype(jnp.bfloat16)

    grid = (n_pad // tm,)
    y = pl.pallas_call(
        edge_projector_kernel,
        out_shape=jax.ShapeDtypeStruct((n_pad, OUT_DIM), out_dtype),
        grid_spec=pltpu.PrefetchScalarGridSpec(
            num_scalar_prefetch=0,
            grid=grid,
            in_specs=[
                pl.BlockSpec((tm, IN_DIM), lambda i: (i, 0)),        # x tile (streams)
                # Constant-index full blocks: VMEM resident, copied once, not per step.
                pl.BlockSpec((IN_DIM, HID_PAD), lambda i: (0, 0)),   # W1 (padded)
                pl.BlockSpec((1, HID_PAD), lambda i: (0, 0)),        # b1 (padded)
                pl.BlockSpec((1, HID_PAD), lambda i: (0, 0)),        # W2 as a row
                pl.BlockSpec((1, 1), lambda i: (0, 0)),              # b2
            ],
            out_specs=pl.BlockSpec((tm, OUT_DIM), lambda i: (i, 0)),
        ),
        compiler_params=pltpu.CompilerParams(
            dimension_semantics=("parallel",),   # shards grid steps across v7x's 2 TCs
        ),
    )(x, w1_p, b1_p, w2_row, b2_p)

    return y[:N]


def reference(x, w1, b1, w2, b2):
    h = jnp.maximum(x @ w1 + jnp.reshape(b1, (1, HID_DIM)), 0.0)
    return h @ w2 + jnp.reshape(b2, (1, OUT_DIM))


if __name__ == "__main__":
    key = jax.random.PRNGKey(0)
    k_x, k_w1, k_b1, k_w2, k_b2 = jax.random.split(key, 5)

    N = 16  # small demo batch; wrapper pads it up to one 128-row tile
    x = jax.random.normal(k_x, (N, IN_DIM), dtype=jnp.float32)

    # Deterministic synthetic parameters (shapes match nn.Linear(600,200)/(200,1)),
    # stored as [in, out] for the kernel.
    w1 = jax.random.normal(k_w1, (IN_DIM, HID_DIM), dtype=jnp.float32) * (1.0 / IN_DIM ** 0.5)
    b1 = jax.random.normal(k_b1, (1, HID_DIM), dtype=jnp.float32) * 0.01
    w2 = jax.random.normal(k_w2, (HID_DIM, OUT_DIM), dtype=jnp.float32) * (1.0 / HID_DIM ** 0.5)
    b2 = jax.random.normal(k_b2, (1, OUT_DIM), dtype=jnp.float32) * 0.01

    ref = reference(x, w1, b1, w2, b2)

    # Exact-semantics f32 path.
    out = jax.block_until_ready(edge_projector(x, w1, b1, w2, b2))
    assert out.shape == (N, OUT_DIM)
    assert jnp.allclose(out, ref, atol=1e-4, rtol=1e-4), "f32 kernel mismatch vs reference"

    # bf16 fast path (streaming inputs in bf16, f32 accumulation) — looser tolerance.
    out_bf16 = jax.block_until_ready(edge_projector(x, w1, b1, w2, b2, cast_bf16=True))
    assert out_bf16.shape == (N, OUT_DIM)
    assert jnp.allclose(out_bf16, ref, atol=5e-2, rtol=5e-2), "bf16 kernel mismatch vs reference"

    print("KERNEL_OK")
</pallas_src>

<mosaic_0001>
module attributes {stable_mosaic.version = 11 : i64} {
  func.func @edge_projector_kernel(%arg0: i32, %arg1: memref<128x600xf32, #tpu.memory_space<vmem>>, %arg2: memref<600x256xf32, #tpu.memory_space<vmem>>, %arg3: memref<1x256xf32, #tpu.memory_space<vmem>>, %arg4: memref<1x256xf32, #tpu.memory_space<vmem>>, %arg5: memref<1x1xf32, #tpu.memory_space<vmem>>, %arg6: memref<128x1xf32, #tpu.memory_space<vmem>>) attributes {dimension_semantics = [#tpu.dimension_semantics<parallel>], iteration_bounds = array<i64: 1>, scalar_prefetch = 0 : i64, scratch_operands = 0 : i64, tpu.core_type = #tpu.core_type<tc>, window_params = [{transform_indices = @transform_0, window_bounds = array<i64: 128, 600>}, {pipeline_mode = #tpu.pipeline_mode<synchronous>, transform_indices = @transform_1, window_bounds = array<i64: 600, 256>}, {pipeline_mode = #tpu.pipeline_mode<synchronous>, transform_indices = @transform_2, window_bounds = array<i64: 1, 256>}, {pipeline_mode = #tpu.pipeline_mode<synchronous>, transform_indices = @transform_3, window_bounds = array<i64: 1, 256>}, {pipeline_mode = #tpu.pipeline_mode<synchronous>, transform_indices = @transform_4, window_bounds = array<i64: 1, 1>}, {transform_indices = @transform_5, window_bounds = array<i64: 128, 1>}]} {
    %c0 = arith.constant 0 : index
    %c0_0 = arith.constant 0 : index
    %0 = vector.load %arg1[%c0, %c0_0] : memref<128x600xf32, #tpu.memory_space<vmem>>, vector<128x600xf32>
    %c0_1 = arith.constant 0 : index
    %c0_2 = arith.constant 0 : index
    %1 = vector.load %arg2[%c0_1, %c0_2] : memref<600x256xf32, #tpu.memory_space<vmem>>, vector<600x256xf32>
    %cst = arith.constant dense<0.000000e+00> : vector<128x256xf32>
    %2 = tpu.matmul %0, %1, %cst {dimension_numbers = #tpu.dot_dimension_numbers<[1], [0], [0], [1], [0, 0, 1, 1], [], []>} : vector<128x600xf32>, vector<600x256xf32>, vector<128x256xf32> -> vector<128x256xf32>
    %c0_3 = arith.constant 0 : index
    %c0_4 = arith.constant 0 : index
    %3 = vector.load %arg3[%c0_3, %c0_4] : memref<1x256xf32, #tpu.memory_space<vmem>>, vector<1x256xf32>
    %4 = vector.broadcast %3 : vector<1x256xf32> to vector<128x256xf32>
    %5 = arith.addf %2, %4 : vector<128x256xf32>
    %cst_5 = arith.constant 0.000000e+00 : f32
    %6 = vector.broadcast %cst_5 : f32 to vector<128x256xf32>
    %7 = arith.maximumf %5, %6 : vector<128x256xf32>
    %c0_6 = arith.constant 0 : index
    %c0_7 = arith.constant 0 : index
    %8 = vector.load %arg4[%c0_6, %c0_7] : memref<1x256xf32, #tpu.memory_space<vmem>>, vector<1x256xf32>
    %9 = vector.broadcast %8 : vector<1x256xf32> to vector<128x256xf32>
    %10 = arith.mulf %7, %9 : vector<128x256xf32>
    %cst_8 = arith.constant dense<0.000000e+00> : vector<128xf32>
    %11 = vector.multi_reduction <add>, %10, %cst_8 [1] : vector<128x256xf32> to vector<128xf32>
    %12 = vector.shape_cast %11 : vector<128xf32> to vector<128x1xf32>
    %c0_9 = arith.constant 0 : index
    %c0_10 = arith.constant 0 : index
    %13 = vector.load %arg5[%c0_9, %c0_10] : memref<1x1xf32, #tpu.memory_space<vmem>>, vector<1x1xf32>
    %14 = vector.broadcast %13 : vector<1x1xf32> to vector<128x1xf32>
    %15 = arith.addf %12, %14 : vector<128x1xf32>
    %c0_11 = arith.constant 0 : index
    %c0_12 = arith.constant 0 : index
    %16 = vector.load %arg6[%c0_11, %c0_12] : memref<128x1xf32, #tpu.memory_space<vmem>>, vector<128x1xf32>
    tpu.vector_store %arg6[%c0_11, %c0_12], %15 {strides = array<i32>} : memref<128x1xf32, #tpu.memory_space<vmem>>, vector<128x1xf32>,
    return
  }
  func.func @transform_0(%arg0: i32) -> (i32, i32) {
    %c0_i32 = arith.constant 0 : i32
    %c0_i32_0 = arith.constant 0 : i32
    return %arg0, %c0_i32 : i32, i32
  }
  func.func @transform_1(%arg0: i32) -> (i32, i32) {
    %c0_i32 = arith.constant 0 : i32
    %c0_i32_0 = arith.constant 0 : i32
    %c0_i32_1 = arith.constant 0 : i32
    return %c0_i32, %c0_i32_0 : i32, i32
  }
  func.func @transform_2(%arg0: i32) -> (i32, i32) {
    %c0_i32 = arith.constant 0 : i32
    %c0_i32_0 = arith.constant 0 : i32
    %c0_i32_1 = arith.constant 0 : i32
    return %c0_i32, %c0_i32_0 : i32, i32
  }
  func.func @transform_3(%arg0: i32) -> (i32, i32) {
    %c0_i32 = arith.constant 0 : i32
    %c0_i32_0 = arith.constant 0 : i32
    %c0_i32_1 = arith.constant 0 : i32
    return %c0_i32, %c0_i32_0 : i32, i32
  }
  func.func @transform_4(%arg0: i32) -> (i32, i32) {
    %c0_i32 = arith.constant 0 : i32
    %c0_i32_0 = arith.constant 0 : i32
    %c0_i32_1 = arith.constant 0 : i32
    return %c0_i32, %c0_i32_0 : i32, i32
  }
  func.func @transform_5(%arg0: i32) -> (i32, i32) {
    %c0_i32 = arith.constant 0 : i32
    %c0_i32_0 = arith.constant 0 : i32
    return %arg0, %c0_i32 : i32, i32
  }
}

</mosaic_0001>

<bundles_post_ra>
// kernel: tpu_custom_call.1
= control target key start
LH: loop header
LB: loop body
LE: loop exit
PB: predicated region body
PF: predicated region fallthrough
CT: control target
= control target key end

     0   :  { %vm264_vm0 = vcmask 719872   ;;  %vm943_vm1 = vcmask 7168   ;;  %s2302_s1 = inlined_call_operand.vmem [shape: f32[600,256], index: 1, kind: input, shape index: {}]   ;;  %s2303_s0 = inlined_call_operand.vmem [shape: f32[128,600], index: 0, kind: input, shape index: {}]   ;;  %s2304_s4 = inlined_call_operand.<no memory space> [shape: f32[1,1], index: 4, kind: input, shape index: {}]   ;;  %s2305_s2 = inlined_call_operand.vmem [shape: f32[1,256], index: 2, kind: input, shape index: {}]   ;;  %s2306_s3 = inlined_call_operand.vmem [shape: f32[1,256], index: 3, kind: input, shape index: {}]   ;;  %s2307_s5 = inlined_call_operand.vmem [shape: f32[128,1], index: 5, kind: output, shape index: {}]  }
   0x1   :  { %v103_v0 = vld [vmem:[%s2302_s1 + $0x8] sm:$0xff]  ;;  %v105_v1 = vld [vmem:[%s2302_s1 + $0x18] sm:$0xff]  ;;  %v102_v5 = vld [vmem:[%s2302_s1] sm:$0xff] }
   0x2   :  { %v167_v2 = vld [vmem:[%s2302_s1 + $0x208] sm:$0xff]  ;;  %v981_v3 = vpack.c.bf16 %v105_v1, %v103_v0  ;;  %v169_v4 = vld [vmem:[%s2302_s1 + $0x218] sm:$0xff]  ;;  %v104_v6 = vld [vmem:[%s2302_s1 + $0x10] sm:$0xff] }
   0x3   :  { %v1307_v7 = vpack.c.bf16 %v169_v4, %v167_v2  ;;  %v983_v8 = vpack.c.bf16 %v104_v6, %v102_v5  ;;  %v166_v9 = vld [vmem:[%s2302_s1 + $0x200] sm:$0xff]  ;;  %v168_v10 = vld [vmem:[%s2302_s1 + $0x210] sm:$0xff]  ;;  %v107_v11 = vld [vmem:[%s2302_s1 + $0x28] sm:$0xff] }
   0x4   :  { %982 = vmatprep.subr.bf16.mxu1 %v981_v3  ;;  %v1318_v12 = vpack.c.bf16 %v168_v10, %v166_v9  ;;  %v109_v13 = vld [vmem:[%s2302_s1 + $0x38] sm:$0xff]  ;;  %v171_v14 = vld [vmem:[%s2302_s1 + $0x228] sm:$0xff]  ;;  %v106_v18 = vld [vmem:[%s2302_s1 + $0x20] sm:$0xff] }
   0x5   :  { %v173_v15 = vld [vmem:[%s2302_s1 + $0x238] sm:$0xff]  ;;  %1046 = vmatprep.subr.bf16.mxu0 %v1307_v7  ;;  %984 = vmatpush1.bf16.msra.mxu1 %v983_v8  ;;  %v985_v16 = vpack.c.bf16 %v109_v13, %v107_v11  ;;  %v108_v19 = vld [vmem:[%s2302_s1 + $0x30] sm:$0xff]  ;;  %v170_v20 = vld [vmem:[%s2302_s1 + $0x220] sm:$0xff] }
   0x6   :  { %v1330_v17 = vpack.c.bf16 %v173_v15, %v171_v14  ;;  %1048 = vmatpush1.bf16.msra.mxu0 %v1318_v12  ;;  %v987_v21 = vpack.c.bf16 %v108_v19, %v106_v18  ;;  %v172_v22 = vld [vmem:[%s2302_s1 + $0x230] sm:$0xff]  ;;  %v111_v23 = vld [vmem:[%s2302_s1 + $0x48] sm:$0xff]  ;;  %v113_v24 = vld [vmem:[%s2302_s1 + $0x58] sm:$0xff] }
   0x7   :  { %986 = vmatprep.subr.bf16.mxu1 %v985_v16  ;;  %v1352_v25 = vpack.c.bf16 %v172_v22, %v170_v20  ;;  %v989_v26 = vpack.c.bf16 %v113_v24, %v111_v23  ;;  %v175_v27 = vld [vmem:[%s2302_s1 + $0x248] sm:$0xff]  ;;  %v177_v28 = vld [vmem:[%s2302_s1 + $0x258] sm:$0xff]  ;;  %v110_v29 = vld [vmem:[%s2302_s1 + $0x40] sm:$0xff] }
   0x8   :  { %1050 = vmatprep.subr.bf16.mxu0 %v1330_v17  ;;  %v1363_v30 = vpack.c.bf16 %v177_v28, %v175_v27  ;;  %v112_v31 = vld [vmem:[%s2302_s1 + $0x50] sm:$0xff]  ;;  %v174_v32 = vld [vmem:[%s2302_s1 + $0x240] sm:$0xff]  ;;  %v115_v35 = vld [vmem:[%s2302_s1 + $0x68] sm:$0xff] }
   0x9   :  { %v176_v33 = vld [vmem:[%s2302_s1 + $0x250] sm:$0xff]  ;;  %988 = vmatpush1.bf16.msra.mxu1 %v987_v21  ;;  %v991_v34 = vpack.c.bf16 %v112_v31, %v110_v29  ;;  %v117_v36 = vld [vmem:[%s2302_s1 + $0x78] sm:$0xff]  ;;  %v179_v37 = vld [vmem:[%s2302_s1 + $0x268] sm:$0xff] }
   0xa   :  { %1052 = vmatpush1.bf16.msra.mxu0 %v1352_v25  ;;  %990 = vmatprep.subr.bf16.mxu1 %v989_v26  ;;  %v1384_v38 = vpack.c.bf16 %v176_v33, %v174_v32  ;;  %v993_v39 = vpack.c.bf16 %v117_v36, %v115_v35  ;;  %v181_v40 = vld [vmem:[%s2302_s1 + $0x278] sm:$0xff]  ;;  %v114_v41 = vld [vmem:[%s2302_s1 + $0x60] sm:$0xff]  ;;  %v116_v42 = vld [vmem:[%s2302_s1 + $0x70] sm:$0xff] }
   0xb   :  { %1054 = vmatprep.subr.bf16.mxu0 %v1363_v30  ;;  %v1396_v43 = vpack.c.bf16 %v181_v40, %v179_v37  ;;  %v178_v44 = vld [vmem:[%s2302_s1 + $0x260] sm:$0xff]  ;;  %v180_v45 = vld [vmem:[%s2302_s1 + $0x270] sm:$0xff]  ;;  %v119_v46 = vld [vmem:[%s2302_s1 + $0x88] sm:$0xff]  ;;  %v995_v50 = vpack.c.bf16 %v116_v42, %v114_v41 }
   0xc   :  { %v121_v47 = vld [vmem:[%s2302_s1 + $0x98] sm:$0xff]  ;;  %v183_v48 = vld [vmem:[%s2302_s1 + $0x288] sm:$0xff]  ;;  %v1417_v51 = vpack.c.bf16 %v180_v45, %v178_v44  ;;  %v118_v53 = vld [vmem:[%s2302_s1 + $0x80] sm:$0xff] }
   0xd   :  { %v185_v49 = vld [vmem:[%s2302_s1 + $0x298] sm:$0xff]  ;;  %992 = vmatpush1.bf16.msra.mxu1 %v991_v34  ;;  %v997_v52 = vpack.c.bf16 %v121_v47, %v119_v46  ;;  %v120_v54 = vld [vmem:[%s2302_s1 + $0x90] sm:$0xff]  ;;  %v182_v55 = vld [vmem:[%s2302_s1 + $0x280] sm:$0xff] }
   0xe   :  { %1056 = vmatpush1.bf16.msra.mxu0 %v1384_v38  ;;  %994 = vmatprep.subr.bf16.mxu1 %v993_v39  ;;  %v1429_v56 = vpack.c.bf16 %v185_v49, %v183_v48  ;;  %v184_v57 = vld [vmem:[%s2302_s1 + $0x290] sm:$0xff]  ;;  %v123_v58 = vld [vmem:[%s2302_s1 + $0xa8] sm:$0xff]  ;;  %v125_v59 = vld [vmem:[%s2302_s1 + $0xb8] sm:$0xff]  ;;  %v999_v62 = vpack.c.bf16 %v120_v54, %v118_v53 }
   0xf   :  { %1058 = vmatprep.subr.bf16.mxu0 %v1396_v43  ;;  %v187_v60 = vld [vmem:[%s2302_s1 + $0x2a8] sm:$0xff]  ;;  %v189_v61 = vld [vmem:[%s2302_s1 + $0x2b8] sm:$0xff]  ;;  %v1447_v63 = vpack.c.bf16 %v184_v57, %v182_v55  ;;  %v1001_v0 = vpack.c.bf16 %v125_v59, %v123_v58  ;;  %v122_v1 = vld [vmem:[%s2302_s1 + $0xa0] sm:$0xff] }
  0x10   :  { %v124_v2 = vld [vmem:[%s2302_s1 + $0xb0] sm:$0xff]  ;;  %v186_v3 = vld [vmem:[%s2302_s1 + $0x2a0] sm:$0xff]  ;;  %v1459_v4 = vpack.c.bf16 %v189_v61, %v187_v60  ;;  %v127_v6 = vld [vmem:[%s2302_s1 + $0xc8] sm:$0xff] }
  0x11   :  { %996 = vmatpush1.bf16.msra.mxu1 %v995_v50  ;;  %v188_v5 = vld [vmem:[%s2302_s1 + $0x2b0] sm:$0xff]  ;;  %v129_v8 = vld [vmem:[%s2302_s1 + $0xd8] sm:$0xff]  ;;  %v191_v9 = vld [vmem:[%s2302_s1 + $0x2c8] sm:$0xff]  ;;  %v1003_v11 = vpack.c.bf16 %v124_v2, %v122_v1 }
  0x12   :  { %1060 = vmatpush1.bf16.msra.mxu0 %v1417_v51  ;;  %998 = vmatprep.subr.bf16.mxu1 %v997_v52  ;;  %v193_v10 = vld [vmem:[%s2302_s1 + $0x2d8] sm:$0xff]  ;;  %v1477_v13 = vpack.c.bf16 %v188_v5, %v186_v3  ;;  %v1005_v14 = vpack.c.bf16 %v129_v8, %v127_v6  ;;  %v126_v15 = vld [vmem:[%s2302_s1 + $0xc0] sm:$0xff]  ;;  %v128_v16 = vld [vmem:[%s2302_s1 + $0xd0] sm:$0xff] }
  0x13   :  { %1062 = vmatprep.subr.bf16.mxu0 %v1429_v56  ;;  %v190_v18 = vld [vmem:[%s2302_s1 + $0x2c0] sm:$0xff]  ;;  %v1489_v19 = vpack.c.bf16 %v193_v10, %v191_v9  ;;  %v192_v20 = vld [vmem:[%s2302_s1 + $0x2d0] sm:$0xff]  ;;  %v131_v21 = vld [vmem:[%s2302_s1 + $0xe8] sm:$0xff]  ;;  %v1007_v26 = vpack.c.bf16 %v128_v16, %v126_v15 }
  0x14   :  { %v133_v22 = vld [vmem:[%s2302_s1 + $0xf8] sm:$0xff]  ;;  %v195_v23 = vld [vmem:[%s2302_s1 + $0x2e8] sm:$0xff]  ;;  %v1507_v27 = vpack.c.bf16 %v192_v20, %v190_v18  ;;  %v130_v29 = vld [vmem:[%s2302_s1 + $0xe0] sm:$0xff] }
  0x15   :  { %1000 = vmatpush1.bf16.msra.mxu1 %v999_v62  ;;  %v197_v24 = vld [vmem:[%s2302_s1 + $0x2f8] sm:$0xff]  ;;  %v1009_v28 = vpack.c.bf16 %v133_v22, %v131_v21  ;;  %v132_v31 = vld [vmem:[%s2302_s1 + $0xf0] sm:$0xff]  ;;  %v194_v32 = vld [vmem:[%s2302_s1 + $0x2e0] sm:$0xff] }
  0x16   :  { %1064 = vmatpush1.bf16.msra.mxu0 %v1447_v63  ;;  %1002 = vmatprep.subr.bf16.mxu1 %v1001_v0  ;;  %v1519_v33 = vpack.c.bf16 %v197_v24, %v195_v23  ;;  %v196_v34 = vld [vmem:[%s2302_s1 + $0x2f0] sm:$0xff]  ;;  %v135_v35 = vld [vmem:[%s2302_s1 + $0x108] sm:$0xff]  ;;  %v137_v36 = vld [vmem:[%s2302_s1 + $0x118] sm:$0xff]  ;;  %v1011_v40 = vpack.c.bf16 %v132_v31, %v130_v29 }
  0x17   :  { %1066 = vmatprep.subr.bf16.mxu0 %v1459_v4  ;;  %v199_v37 = vld [vmem:[%s2302_s1 + $0x308] sm:$0xff]  ;;  %v201_v39 = vld [vmem:[%s2302_s1 + $0x318] sm:$0xff]  ;;  %v1537_v41 = vpack.c.bf16 %v196_v34, %v194_v32  ;;  %v1013_v42 = vpack.c.bf16 %v137_v36, %v135_v35  ;;  %v134_v44 = vld [vmem:[%s2302_s1 + $0x100] sm:$0xff] }
  0x18   :  { %v136_v45 = vld [vmem:[%s2302_s1 + $0x110] sm:$0xff]  ;;  %v198_v46 = vld [vmem:[%s2302_s1 + $0x300] sm:$0xff]  ;;  %v1549_v47 = vpack.c.bf16 %v201_v39, %v199_v37  ;;  %v139_v49 = vld [vmem:[%s2302_s1 + $0x128] sm:$0xff] }
  0x19   :  { %1004 = vmatpush1.bf16.msra.mxu1 %v1003_v11  ;;  %v200_v48 = vld [vmem:[%s2302_s1 + $0x310] sm:$0xff]  ;;  %v141_v50 = vld [vmem:[%s2302_s1 + $0x138] sm:$0xff]  ;;  %v203_v52 = vld [vmem:[%s2302_s1 + $0x328] sm:$0xff]  ;;  %v1015_v54 = vpack.c.bf16 %v136_v45, %v134_v44 }
  0x1a   :  { %1068 = vmatpush1.bf16.msra.mxu0 %v1477_v13  ;;  %1006 = vmatprep.subr.bf16.mxu1 %v1005_v14  ;;  %v205_v53 = vld [vmem:[%s2302_s1 + $0x338] sm:$0xff]  ;;  %v1567_v55 = vpack.c.bf16 %v200_v48, %v198_v46  ;;  %v1017_v57 = vpack.c.bf16 %v141_v50, %v139_v49  ;;  %v138_v58 = vld [vmem:[%s2302_s1 + $0x120] sm:$0xff]  ;;  %v140_v59 = vld [vmem:[%s2302_s1 + $0x130] sm:$0xff] }
  0x1b   :  { %1070 = vmatprep.subr.bf16.mxu0 %v1489_v19  ;;  %v202_v60 = vld [vmem:[%s2302_s1 + $0x320] sm:$0xff]  ;;  %v1579_v61 = vpack.c.bf16 %v205_v53, %v203_v52  ;;  %v204_v62 = vld [vmem:[%s2302_s1 + $0x330] sm:$0xff]  ;;  %v143_v0 = vld [vmem:[%s2302_s1 + $0x148] sm:$0xff]  ;;  %v1019_v5 = vpack.c.bf16 %v140_v59, %v138_v58 }
  0x1c   :  { %v145_v1 = vld [vmem:[%s2302_s1 + $0x158] sm:$0xff]  ;;  %v207_v2 = vld [vmem:[%s2302_s1 + $0x348] sm:$0xff]  ;;  %v1597_v6 = vpack.c.bf16 %v204_v62, %v202_v60  ;;  %v142_v9 = vld [vmem:[%s2302_s1 + $0x140] sm:$0xff] }
  0x1d   :  { %1008 = vmatpush1.bf16.msra.mxu1 %v1007_v26  ;;  %v209_v3 = vld [vmem:[%s2302_s1 + $0x358] sm:$0xff]  ;;  %v1021_v8 = vpack.c.bf16 %v145_v1, %v143_v0  ;;  %v144_v10 = vld [vmem:[%s2302_s1 + $0x150] sm:$0xff]  ;;  %v206_v11 = vld [vmem:[%s2302_s1 + $0x340] sm:$0xff] }
  0x1e   :  { %1072 = vmatpush1.bf16.msra.mxu0 %v1507_v27  ;;  %1010 = vmatprep.subr.bf16.mxu1 %v1009_v28  ;;  %v1609_v14 = vpack.c.bf16 %v209_v3, %v207_v2  ;;  %v208_v15 = vld [vmem:[%s2302_s1 + $0x350] sm:$0xff]  ;;  %v147_v16 = vld [vmem:[%s2302_s1 + $0x168] sm:$0xff]  ;;  %v149_v18 = vld [vmem:[%s2302_s1 + $0x178] sm:$0xff]  ;;  %v1023_v22 = vpack.c.bf16 %v144_v10, %v142_v9 }
  0x1f   :  { %1074 = vmatprep.subr.bf16.mxu0 %v1519_v33  ;;  %v211_v20 = vld [vmem:[%s2302_s1 + $0x368] sm:$0xff]  ;;  %v213_v21 = vld [vmem:[%s2302_s1 + $0x378] sm:$0xff]  ;;  %v146_v23 = vld [vmem:[%s2302_s1 + $0x160] sm:$0xff]  ;;  %v1630_v24 = vpack.c.bf16 %v208_v15, %v206_v11  ;;  %v1025_v26 = vpack.c.bf16 %v149_v18, %v147_v16 }
  0x20   :  { %v148_v28 = vld [vmem:[%s2302_s1 + $0x170] sm:$0xff]  ;;  %v210_v29 = vld [vmem:[%s2302_s1 + $0x360] sm:$0xff]  ;;  %v1642_v32 = vpack.c.bf16 %v213_v21, %v211_v20  ;;  %v151_v34 = vld [vmem:[%s2302_s1 + $0x188] sm:$0xff] }
  0x21   :  { %1012 = vmatpush1.bf16.msra.mxu1 %v1011_v40  ;;  %v212_v31 = vld [vmem:[%s2302_s1 + $0x370] sm:$0xff]  ;;  %v153_v35 = vld [vmem:[%s2302_s1 + $0x198] sm:$0xff]  ;;  %v23_v36 = vld [vmem:[%s2303_s0 + $0x8] sm:$0xff] }
  0x22   :  { %1076 = vmatpush1.bf16.msra.mxu0 %v1537_v41  ;;  %1014 = vmatprep.subr.bf16.mxu1 %v1013_v42  ;;  %v215_v37 = vld [vmem:[%s2302_s1 + $0x388] sm:$0xff]  ;;  %v217_v39 = vld [vmem:[%s2302_s1 + $0x398] sm:$0xff]  ;;  %v1027_v42 = vpack.c.bf16 %v148_v28, %v146_v23  ;;  %v1663_v44 = vpack.c.bf16 %v212_v31, %v210_v29  ;;  %v1029_v45 = vpack.c.bf16 %v153_v35, %v151_v34  ;;  %v150_v46 = vld [vmem:[%s2302_s1 + $0x180] sm:$0xff] }
  0x23   :  { %1078 = vmatprep.subr.bf16.mxu0 %v1549_v47  ;;  %377 = vmatprep.mubr.f32.mxu1 %v23_v36  ;;  %v25_v40 = vld [vmem:[%s2303_s0 + $0x18] sm:$0xff]  ;;  %v152_v48 = vld [vmem:[%s2302_s1 + $0x190] sm:$0xff]  ;;  %v214_v49 = vld [vmem:[%s2302_s1 + $0x380] sm:$0xff]  ;;  %v1675_v50 = vpack.c.bf16 %v217_v39, %v215_v37 }
  0x24   :  { %538 = vmatprep.mubr.f32.mxu0 %v25_v40  ;;  %v216_v52 = vld [vmem:[%s2302_s1 + $0x390] sm:$0xff]  ;;  %v155_v53 = vld [vmem:[%s2302_s1 + $0x1a8] sm:$0xff]  ;;  %v221_v58 = vld [vmem:[%s2302_s1 + $0x3b8] sm:$0xff]  ;;  %v1031_v59 = vpack.c.bf16 %v152_v48, %v150_v46 }
  0x25   :  { %1016 = vmatpush1.bf16.msra.mxu1 %v1015_v54  ;;  %v157_v54 = vld [vmem:[%s2302_s1 + $0x1b8] sm:$0xff]  ;;  %v1693_v60 = vpack.c.bf16 %v216_v52, %v214_v49  ;;  %v154_v0 = vld [vmem:[%s2302_s1 + $0x1a0] sm:$0xff]  ;;  %v156_v1 = vld [vmem:[%s2302_s1 + $0x1b0] sm:$0xff] }
  0x26   :  { %1080 = vmatpush1.bf16.msra.mxu0 %v1567_v55  ;;  %1018 = vmatprep.subr.bf16.mxu1 %v1017_v57  ;;  %v219_v57 = vld [vmem:[%s2302_s1 + $0x3a8] sm:$0xff]  ;;  %v1033_v62 = vpack.c.bf16 %v157_v54, %v155_v53  ;;  %v218_v2 = vld [vmem:[%s2302_s1 + $0x3a0] sm:$0xff]  ;;  %v161_v9 = vld [vmem:[%s2302_s1 + $0x1d8] sm:$0xff]  ;;  %v1035_v15 = vpack.c.bf16 %v156_v1, %v154_v0 }
  0x27   :  { %1082 = vmatprep.subr.bf16.mxu0 %v1579_v61  ;;  %v1705_v3 = vpack.c.bf16 %v221_v58, %v219_v57  ;;  %v223_v10 = vld [vmem:[%s2302_s1 + $0x3c8] sm:$0xff]  ;;  %v225_v11 = vld [vmem:[%s2302_s1 + $0x3d8] sm:$0xff]  ;;  %v158_v20 = vld [vmem:[%s2302_s1 + $0x1c0] sm:$0xff] }
  0x28   :  { %v160_v21 = vld [vmem:[%s2302_s1 + $0x1d0] sm:$0xff]  ;;  %v1735_v23 = vpack.c.bf16 %v225_v11, %v223_v10  ;;  %v163_v28 = vld [vmem:[%s2302_s1 + $0x1e8] sm:$0xff]  ;;  %v165_v29 = vld [vmem:[%s2302_s1 + $0x1f8] sm:$0xff] }
  0x29   :  { %1020 = vmatpush1.bf16.msra.mxu1 %v1019_v5  ;;  %v220_v5 = vld [vmem:[%s2302_s1 + $0x3b0] sm:$0xff]  ;;  %v227_v31 = vld [vmem:[%s2302_s1 + $0x3e8] sm:$0xff]  ;;  %v229_v34 = vld [vmem:[%s2302_s1 + $0x3f8] sm:$0xff]  ;;  %v1039_v35 = vpack.c.bf16 %v160_v21, %v158_v20  ;;  %v1041_v37 = vpack.c.bf16 %v165_v29, %v163_v28 }
  0x2a   :  { %1084 = vmatpush1.bf16.msra.mxu0 %v1597_v6  ;;  %1022 = vmatprep.subr.bf16.mxu1 %v1021_v8  ;;  %v159_v8 = vld [vmem:[%s2302_s1 + $0x1c8] sm:$0xff]  ;;  %v1723_v16 = vpack.c.bf16 %v220_v5, %v218_v2  ;;  %v162_v39 = vld [vmem:[%s2302_s1 + $0x1e0] sm:$0xff]  ;;  %v164_v40 = vld [vmem:[%s2302_s1 + $0x1f0] sm:$0xff] }
  0x2b   :  { %1086 = vmatprep.subr.bf16.mxu0 %v1609_v14  ;;  %v1037_v18 = vpack.c.bf16 %v161_v9, %v159_v8  ;;  %v228_v46 = vld [vmem:[%s2302_s1 + $0x3f0] sm:$0xff]  ;;  %v231_v48 = vld [vmem:[%s2302_s1 + $0x408] sm:$0xff]  ;;  %v233_v49 = vld [vmem:[%s2302_s1 + $0x418] sm:$0xff]  ;;  %v1043_v52 = vpack.c.bf16 %v164_v40, %v162_v39 }
  0x2c   :  { %v1109_v54 = vpack.c.bf16 %v233_v49, %v231_v48  ;;  %v230_v57 = vld [vmem:[%s2302_s1 + $0x400] sm:$0xff]  ;;  %v232_v58 = vld [vmem:[%s2302_s1 + $0x410] sm:$0xff]  ;;  %v237_v0 = vld [vmem:[%s2302_s1 + $0x438] sm:$0xff] }
  0x2d   :  { %1024 = vmatpush1.bf16.msra.mxu1 %v1023_v22  ;;  %v222_v22 = vld [vmem:[%s2302_s1 + $0x3c0] sm:$0xff]  ;;  %v24_v1 = vld [vmem:[%s2303_s0 + $0x10] sm:$0xff]  ;;  %v1111_v8 = vpack.c.bf16 %v232_v58, %v230_v57  ;;  %v27_v11 = vld [vmem:[%s2303_s0 + $0x28] sm:$0xff] }
  0x2e   :  { %1088 = vmatpush1.bf16.msra.mxu0 %v1630_v24  ;;  %1026 = vmatprep.subr.bf16.mxu1 %v1025_v26  ;;  %v224_v26 = vld [vmem:[%s2302_s1 + $0x3d0] sm:$0xff]  ;;  %v30_v5 = vld [vmem:[%s2303_s0 + $0x40] sm:$0xff]  ;;  %v29_v20 = vld [vmem:[%s2303_s0 + $0x38] sm:$0xff] }
  0x2f   :  { %1090 = vmatprep.subr.bf16.mxu0 %v1642_v32  ;;  %v1753_v36 = vpack.c.bf16 %v224_v26, %v222_v22  ;;  %v28_v2 = vld [vmem:[%s2303_s0 + $0x30] sm:$0xff]  ;;  %v35_v21 = vld [vmem:[%s2303_s0 + $0x68] sm:$0xff]  ;;  %v238_v28 = vld [vmem:[%s2302_s1 + $0x440] sm:$0xff] }
  0x30   :  { %v236_v10 = vld [vmem:[%s2302_s1 + $0x430] sm:$0xff]  ;;  %v247_v48 = vld [vmem:[%s2302_s1 + $0x488] sm:$0xff]  ;;  %v249_v49 = vld [vmem:[%s2302_s1 + $0x498] sm:$0xff] }
  0x31   :  { %1028 = vmatpush1.bf16.msra.mxu1 %v1027_v42  ;;  %v1762_v42 = vpack.c.bf16 %v229_v34, %v227_v31  ;;  %v32_v29 = vld [vmem:[%s2303_s0 + $0x50] sm:$0xff]  ;;  %v243_v31 = vld [vmem:[%s2302_s1 + $0x468] sm:$0xff]  ;;  %v245_v34 = vld [vmem:[%s2302_s1 + $0x478] sm:$0xff]  ;;  %v1125_v58 = vpack.c.bf16 %v249_v49, %v247_v48 }
  0x32   :  { %1092 = vmatpush1.bf16.msra.mxu0 %v1663_v44  ;;  %1030 = vmatprep.subr.bf16.mxu1 %v1029_v45  ;;  %v226_v45 = vld [vmem:[%s2302_s1 + $0x3e0] sm:$0xff]  ;;  %v1121_v40 = vpack.c.bf16 %v245_v34, %v243_v31  ;;  %v65_v31 = vld [vmem:[%s2303_s0 + $0x158] sm:$0xff]  ;;  %v84_v48 = vld [vmem:[%s2303_s0 + $0x1f0] sm:$0xff] }
  0x33   :  { %1094 = vmatprep.subr.bf16.mxu0 %v1675_v50  ;;  %v1777_v53 = vpack.c.bf16 %v228_v46, %v226_v45  ;;  %v242_v45 = vld [vmem:[%s2302_s1 + $0x460] sm:$0xff]  ;;  %v37_v46 = vld [vmem:[%s2303_s0 + $0x78] sm:$0xff] }
  0x34   :  { %v70_v34 = vld [vmem:[%s2303_s0 + $0x180] sm:$0xff] }
  0x35   :  { %1032 = vmatpush1.bf16.msra.mxu1 %v1031_v59  ;;  %v22_v59 = vld [vmem:[%s2303_s0] sm:$0xff] }
  0x36   :  { %1096 = vmatpush1.bf16.msra.mxu0 %v1693_v60  ;;  %1034 = vmatprep.subr.bf16.mxu1 %v1033_v62  ;;  %v235_v62 = vld [vmem:[%s2302_s1 + $0x428] sm:$0xff]  ;;  %v86_v49 = vld [vmem:[%s2303_s0 + $0x200] sm:$0xff] }
  0x37   :  { %1098 = vmatprep.subr.bf16.mxu0 %v1705_v3  ;;  %v1113_v9 = vpack.c.bf16 %v237_v0, %v235_v62  ;;  %v42_v62 = vld [vmem:[%s2303_s0 + $0xa0] sm:$0xff]  ;;  %v44_v0 = vld [vmem:[%s2303_s0 + $0xb0] sm:$0xff] }
  0x39   :  { %1036 = vmatpush1.bf16.msra.mxu1 %v1035_v15  ;;  %v239_v15 = vld [vmem:[%s2302_s1 + $0x448] sm:$0xff] }
  0x3a   :  { %1100 = vmatpush1.bf16.msra.mxu0 %v1723_v16  ;;  %1038 = vmatprep.subr.bf16.mxu1 %v1037_v18  ;;  %v241_v18 = vld [vmem:[%s2302_s1 + $0x458] sm:$0xff] }
  0x3b   :  { %1102 = vmatprep.subr.bf16.mxu0 %v1735_v23  ;;  %v1117_v26 = vpack.c.bf16 %v241_v18, %v239_v15  ;;  %v57_v15 = vld [vmem:[%s2303_s0 + $0x118] sm:$0xff]  ;;  %v63_v18 = vld [vmem:[%s2303_s0 + $0x148] sm:$0xff] }
  0x3d   :  { %1040 = vmatpush1.bf16.msra.mxu1 %v1039_v35  ;;  %v34_v35 = vld [vmem:[%s2303_s0 + $0x60] sm:$0xff] }
  0x3e   :  { %1104 = vmatpush1.bf16.msra.mxu0 %v1753_v36  ;;  %1042 = vmatprep.subr.bf16.mxu1 %v1041_v37  ;;  %v40_v37 = vld [vmem:[%s2303_s0 + $0x90] sm:$0xff] }
  0x3f   :  { %1106 = vmatprep.subr.bf16.mxu0 %v1762_v42 }
  0x41   :  { %1044 = vmatpush1.bf16.msra.mxu1 %v1043_v52  ;;  %v39_v52 = vld [vmem:[%s2303_s0 + $0x88] sm:$0xff] }
  0x42   :  { %1108 = vmatpush1.bf16.msra.mxu0 %v1777_v53  ;;  %1129 = vmatprep.subr.bf16.mxu1 %v1307_v7  ;;  %v234_v7 = vld [vmem:[%s2302_s1 + $0x420] sm:$0xff] }
  0x43   :  { %1110 = vmatprep.subr.bf16.mxu0 %v1109_v54  ;;  %v1115_v22 = vpack.c.bf16 %v236_v10, %v234_v7  ;;  %v45_v54 = vld [vmem:[%s2303_s0 + $0xb8] sm:$0xff]  ;;  %v250_v7 = vld [vmem:[%s2302_s1 + $0x4a0] sm:$0xff] }
  0x44   :  { %378 = vmatmul.mubr.f32.vlgmr.msra.gmra.mrb[0].mxu1 %v22_v59  ;;  %v246_v59 = vld [vmem:[%s2302_s1 + $0x480] sm:$0xff] }
  0x45   :  { %539 = vmatmul.mubr.f32.vlgmr.msra.gmra.mrb[0].mxu0 %v24_v1  ;;  %1145 = vmatpush1.bf16.msra.mxu1 %v1318_v12  ;;  %v33_v12 = vld [vmem:[%s2303_s0 + $0x58] sm:$0xff]  ;;  %v48_v1 = vld [vmem:[%s2303_s0 + $0xd0] sm:$0xff]  ;;  %v54_v10 = vld [vmem:[%s2303_s0 + $0x100] sm:$0xff] }
  0x46   :  { %383 = vmatprep.mubr.f32.mxu1 %v28_v2  ;;  %544 = vmatprep.mubr.f32.mxu0 %v30_v5  ;;  %v47_v5 = vld [vmem:[%s2303_s0 + $0xc8] sm:$0xff] }
  0x47   :  { %1112 = vmatpush1.bf16.msra.mxu0 %v1111_v8  ;;  %1130 = vmatprep.subr.bf16.mxu1 %v1330_v17  ;;  %v240_v17 = vld [vmem:[%s2302_s1 + $0x450] sm:$0xff]  ;;  %v49_v8 = vld [vmem:[%s2303_s0 + $0xd8] sm:$0xff] }
  0x48   :  { %384 = vmatmul.mubr.f32.gmra.mrb[2].mxu1 %v27_v11  ;;  %1114 = vmatprep.subr.bf16.mxu0 %v1113_v9  ;;  %v1119_v39 = vpack.c.bf16 %v240_v17, %v238_v28  ;;  %v55_v9 = vld [vmem:[%s2303_s0 + $0x108] sm:$0xff]  ;;  %v58_v11 = vld [vmem:[%s2303_s0 + $0x120] sm:$0xff]  ;;  %v88_v28 = vld [vmem:[%s2303_s0 + $0x210] sm:$0xff] }
  0x49   :  { %545 = vmatmul.mubr.f32.gmra.mrb[2].mxu0 %v29_v20  ;;  %1146 = vmatpush1.bf16.msra.mxu1 %v1352_v25  ;;  %v38_v25 = vld [vmem:[%s2303_s0 + $0x80] sm:$0xff]  ;;  %v1258_v20 = vmov 0.0   ;;  %v93_v17 = vld [vmem:[%s2303_s0 + $0x238] sm:$0xff] }
  0x4a   :  { %389 = vmatprep.mubr.f32.mxu1 %v33_v12  ;;  %550 = vmatprep.mubr.f32.mxu0 %v35_v21  ;;  %v68_v12 = vld [vmem:[%s2303_s0 + $0x170] sm:$0xff]  ;;  %v73_v21 = vld [vmem:[%s2303_s0 + $0x198] sm:$0xff] }
  0x4b   :  { %1131 = vmatprep.subr.bf16.mxu1 %v1363_v30  ;;  %1116 = vmatpush1.bf16.msra.mxu0 %v1115_v22  ;;  %v244_v30 = vld [vmem:[%s2302_s1 + $0x470] sm:$0xff]  ;;  %v78_v22 = vld [vmem:[%s2303_s0 + $0x1c0] sm:$0xff] }
  0x4c   :  { %390 = vmatmul.mubr.f32.gmra.mrb[4].mxu1 %v32_v29  ;;  %1118 = vmatprep.subr.bf16.mxu0 %v1117_v26  ;;  %v1123_v57 = vpack.c.bf16 %v244_v30, %v242_v45  ;;  %v83_v26 = vld [vmem:[%s2303_s0 + $0x1e8] sm:$0xff]  ;;  %v98_v29 = vld [vmem:[%s2303_s0 + $0x260] sm:$0xff]  ;;  %v81_v30 = vld [vmem:[%s2303_s0 + $0x1d8] sm:$0xff] }
  0x4d   :  { %551 = vmatmul.mubr.f32.gmra.mrb[4].mxu0 %v34_v35  ;;  %1147 = vmatpush1.bf16.msra.mxu1 %v1384_v38  ;;  %v43_v38 = vld [vmem:[%s2303_s0 + $0xa8] sm:$0xff] }
  0x4e   :  { %395 = vmatprep.mubr.f32.mxu1 %v38_v25  ;;  %556 = vmatprep.mubr.f32.mxu0 %v40_v37  ;;  %v71_v35 = vld [vmem:[%s2303_s0 + $0x188] sm:$0xff]  ;;  %v74_v37 = vld [vmem:[%s2303_s0 + $0x1a0] sm:$0xff] }
  0x4f   :  { %1132 = vmatprep.subr.bf16.mxu1 %v1396_v43  ;;  %1120 = vmatpush1.bf16.msra.mxu0 %v1119_v39  ;;  %v248_v43 = vld [vmem:[%s2302_s1 + $0x490] sm:$0xff]  ;;  %v75_v25 = vld [vmem:[%s2303_s0 + $0x1a8] sm:$0xff] }
  0x50   :  { %396 = vmatmul.mubr.f32.gmra.mrb[6].mxu1 %v37_v46  ;;  %1122 = vmatprep.subr.bf16.mxu0 %v1121_v40  ;;  %v1127_v2 = vpack.c.bf16 %v248_v43, %v246_v59  ;;  %v76_v39 = vld [vmem:[%s2303_s0 + $0x1b0] sm:$0xff]  ;;  %v79_v45 = vld [vmem:[%s2303_s0 + $0x1c8] sm:$0xff]  ;;  %v85_v46 = vld [vmem:[%s2303_s0 + $0x1f8] sm:$0xff] }
  0x51   :  { %557 = vmatmul.mubr.f32.gmra.mrb[6].mxu0 %v39_v52  ;;  %1148 = vmatpush1.bf16.msra.mxu1 %v1417_v51  ;;  %v50_v51 = vld [vmem:[%s2303_s0 + $0xe0] sm:$0xff]  ;;  %v80_v40 = vld [vmem:[%s2303_s0 + $0x1d0] sm:$0xff] }
  0x52   :  { %401 = vmatprep.mubr.f32.mxu1 %v43_v38  ;;  %562 = vmatprep.mubr.f32.mxu0 %v45_v54  ;;  %v90_v52 = vld [vmem:[%s2303_s0 + $0x220] sm:$0xff]  ;;  %v89_v38 = vld [vmem:[%s2303_s0 + $0x218] sm:$0xff]  ;;  %v91_v54 = vld [vmem:[%s2303_s0 + $0x228] sm:$0xff] }
  0x53   :  { %1133 = vmatprep.subr.bf16.mxu1 %v1429_v56  ;;  %1124 = vmatpush1.bf16.msra.mxu0 %v1123_v57  ;;  %v251_v56 = vld [vmem:[%s2302_s1 + $0x4a8] sm:$0xff]  ;;  %v96_v59 = vld [vmem:[%s2303_s0 + $0x250] sm:$0xff] }
  0x54   :  { %402 = vmatmul.mubr.f32.gmra.mrb[8].mxu1 %v42_v62  ;;  %1126 = vmatprep.subr.bf16.mxu0 %v1125_v58  ;;  %v95_v57 = vld [vmem:[%s2303_s0 + $0x248] sm:$0xff]  ;;  %v94_v58 = vld [vmem:[%s2303_s0 + $0x240] sm:$0xff]  ;;  %v100_v43 = vld [vmem:[%s2303_s0 + $0x270] sm:$0xff] }
  0x55   :  { %563 = vmatmul.mubr.f32.gmra.mrb[8].mxu0 %v44_v0  ;;  %1149 = vmatpush1.bf16.msra.mxu1 %v1447_v63  ;;  %v53_v63 = vld [vmem:[%s2303_s0 + $0xf8] sm:$0xff]  ;;  %v99_v62 = vld [vmem:[%s2303_s0 + $0x268] sm:$0xff] }
  0x56   :  { %407 = vmatprep.mubr.f32.mxu1 %v48_v1  ;;  %568 = vmatprep.mubr.f32.mxu0 %v50_v51  ;;  %v101_v0 = vld [vmem:[%s2303_s0 + $0x278] sm:$0xff]  ;;  %v10_v1 = vstv %s2304_s4 }
  0x57   :  { %1134 = vmatprep.subr.bf16.mxu1 %v1459_v4  ;;  %1128 = vmatpush1.bf16.msra.mxu0 %v1127_v2  ;;  %v52_v4 = vld [vmem:[%s2303_s0 + $0xf0] sm:$0xff]  ;;  %11 = vst [vmem:[#allocation2] sm:$0x1] %v10_v1 }
  0x58   :  { %408 = vmatmul.mubr.f32.gmra.mrb[10].mxu1 %v47_v5  ;;  %655 = vmatprep.subr.mxu0 %v251_v56 }
  0x59   :  { %569 = vmatmul.mubr.f32.gmra.mrb[10].mxu0 %v49_v8  ;;  %1150 = vmatpush1.bf16.msra.mxu1 %v1477_v13  ;;  %v60_v13 = vld [vmem:[%s2303_s0 + $0x130] sm:$0xff] }
  0x5a   :  { %413 = vmatprep.mubr.f32.mxu1 %v53_v63  ;;  %574 = vmatprep.mubr.f32.mxu0 %v55_v9 }
  0x5b   :  { %1135 = vmatprep.subr.bf16.mxu1 %v1489_v19  ;;  %656 = vmatpush1.msra.mxu0 %v250_v7  ;;  %v59_v19 = vld [vmem:[%s2303_s0 + $0x128] sm:$0xff] }
  0x5c   :  { %414 = vmatmul.mubr.f32.gmra.mrb[12].mxu1 %v52_v4  ;;  %v254_v4 = vlaneseq }
  0x5d   :  { %575 = vmatmul.mubr.f32.gmra.mrb[12].mxu0 %v54_v10  ;;  %1151 = vmatpush1.bf16.msra.mxu1 %v1507_v27  ;;  %v62_v27 = vld [vmem:[%s2303_s0 + $0x140] sm:$0xff] }
  0x5e   :  { %419 = vmatprep.mubr.f32.mxu1 %v58_v11  ;;  %580 = vmatprep.mubr.f32.mxu0 %v60_v13  ;;  %v255_v13 = vshrl.u32 %v254_v4, 7 }
  0x5f   :  { %1136 = vmatprep.subr.bf16.mxu1 %v1519_v33  ;;  %v26_v33 = vld [vmem:[%s2303_s0 + $0x20] sm:$0xff] }
  0x60   :  { %420 = vmatmul.mubr.f32.gmra.mrb[14].mxu1 %v57_v15 }
  0x61   :  { %581 = vmatmul.mubr.f32.gmra.mrb[14].mxu0 %v59_v19  ;;  %1152 = vmatpush1.bf16.msra.mxu1 %v1537_v41  ;;  %v67_v41 = vld [vmem:[%s2303_s0 + $0x168] sm:$0xff] }
  0x62   :  { %425 = vmatprep.mubr.f32.mxu1 %v63_v18  ;;  %699 = vmatprep.mubr.f32.mxu0 %v1258_v20  ;;  %v256_v18 = vsub.s32 0, %v255_v13 }
  0x63   :  { %1137 = vmatprep.subr.bf16.mxu1 %v1549_v47  ;;  %v31_v47 = vld [vmem:[%s2303_s0 + $0x48] sm:$0xff] }
  0x64   :  { %426 = vmatmul.mubr.f32.gmra.mrb[16].mxu1 %v62_v27 }
  0x65   :  { %964 = vmatmul.mubr.msk.f32.vlgmr.msra.gmra.mrb[0].mxu0 %vm264_vm0, %v26_v33  ;;  %1153 = vmatpush1.bf16.msra.mxu1 %v1567_v55  ;;  %v72_v55 = vld [vmem:[%s2303_s0 + $0x190] sm:$0xff]  ;;  %v260_v33 = vsub.s32 1, %v255_v13 }
  0x66   :  { %431 = vmatprep.mubr.f32.mxu1 %v68_v12  ;;  %705 = vmatprep.mubr.f32.mxu0 %v1258_v20 }
  0x67   :  { %1138 = vmatprep.subr.bf16.mxu1 %v1579_v61  ;;  %v36_v61 = vld [vmem:[%s2303_s0 + $0x70] sm:$0xff] }
  0x68   :  { %432 = vmatmul.mubr.f32.gmra.mrb[18].mxu1 %v67_v41 }
  0x69   :  { %965 = vmatmul.mubr.msk.f32.gmra.mrb[2].mxu0 %vm264_vm0, %v31_v47  ;;  %1154 = vmatpush1.bf16.msra.mxu1 %v1597_v6  ;;  %v77_v6 = vld [vmem:[%s2303_s0 + $0x1b8] sm:$0xff] }
  0x6a   :  { %437 = vmatprep.mubr.f32.mxu1 %v73_v21  ;;  %711 = vmatprep.mubr.f32.mxu0 %v1258_v20 }
  0x6b   :  { %1139 = vmatprep.subr.bf16.mxu1 %v1609_v14  ;;  %v41_v14 = vld [vmem:[%s2303_s0 + $0x98] sm:$0xff] }
  0x6c   :  { %438 = vmatmul.mubr.f32.gmra.mrb[20].mxu1 %v72_v55 }
  0x6d   :  { %966 = vmatmul.mubr.msk.f32.gmra.mrb[4].mxu0 %vm264_vm0, %v36_v61  ;;  %1155 = vmatpush1.bf16.msra.mxu1 %v1630_v24  ;;  %v82_v24 = vld [vmem:[%s2303_s0 + $0x1e0] sm:$0xff] }
  0x6e   :  { %443 = vmatprep.mubr.f32.mxu1 %v78_v22  ;;  %717 = vmatprep.mubr.f32.mxu0 %v1258_v20  ;;  %v828_v61 = vld [vmem:[%s2306_s3] sm:$0x3] }
  0x6f   :  { %1140 = vmatprep.subr.bf16.mxu1 %v1642_v32  ;;  %v46_v32 = vld [vmem:[%s2303_s0 + $0xc0] sm:$0xff] }
  0x70   :  { %444 = vmatmul.mubr.f32.gmra.mrb[22].mxu1 %v77_v6 }
  0x71   :  { %967 = vmatmul.mubr.msk.f32.gmra.mrb[6].mxu0 %vm264_vm0, %v41_v14  ;;  %1156 = vmatpush1.bf16.msra.mxu1 %v1663_v44  ;;  %v87_v44 = vld [vmem:[%s2303_s0 + $0x208] sm:$0xff] }
  0x72   :  { %449 = vmatprep.mubr.f32.mxu1 %v83_v26  ;;  %723 = vmatprep.mubr.f32.mxu0 %v1258_v20 }
  0x73   :  { %1141 = vmatprep.subr.bf16.mxu1 %v1675_v50  ;;  %v51_v50 = vld [vmem:[%s2303_s0 + $0xe8] sm:$0xff] }
  0x74   :  { %450 = vmatmul.mubr.f32.gmra.mrb[24].mxu1 %v82_v24 }
  0x75   :  { %968 = vmatmul.mubr.msk.f32.gmra.mrb[8].mxu0 %vm264_vm0, %v46_v32  ;;  %1157 = vmatpush1.bf16.msra.mxu1 %v1693_v60  ;;  %v92_v60 = vld [vmem:[%s2303_s0 + $0x230] sm:$0xff]  ;;  %v2166_v32 = vrot.slane %v828_v61, %v256_v18 }
  0x76   :  { %455 = vmatprep.mubr.f32.mxu1 %v88_v28  ;;  %729 = vmatprep.mubr.f32.mxu0 %v1258_v20 }
  0x77   :  { %1142 = vmatprep.subr.bf16.mxu1 %v1705_v3  ;;  %v56_v3 = vld [vmem:[%s2303_s0 + $0x110] sm:$0xff] }
  0x78   :  { %456 = vmatmul.mubr.f32.gmra.mrb[26].mxu1 %v87_v44  ;;  %v2168_v44 = vrot.slane %v828_v61, %v260_v33 }
  0x79   :  { %969 = vmatmul.mubr.msk.f32.gmra.mrb[10].mxu0 %vm264_vm0, %v51_v50  ;;  %1158 = vmatpush1.bf16.msra.mxu1 %v1723_v16  ;;  %v97_v16 = vld [vmem:[%s2303_s0 + $0x258] sm:$0xff] }
  0x7a   :  { %461 = vmatprep.mubr.f32.mxu1 %v93_v17  ;;  %735 = vmatprep.mubr.f32.mxu0 %v1258_v20 }
  0x7b   :  { %1143 = vmatprep.subr.bf16.mxu1 %v1735_v23  ;;  %v61_v23 = vld [vmem:[%s2303_s0 + $0x138] sm:$0xff] }
  0x7c   :  { %462 = vmatmul.mubr.f32.gmra.mrb[28].mxu1 %v92_v60 }
  0x7d   :  { %970 = vmatmul.mubr.msk.f32.gmra.mrb[12].mxu0 %vm264_vm0, %v56_v3  ;;  %1159 = vmatpush1.bf16.msra.mxu1 %v1753_v36  ;;  %v64_v36 = vld [vmem:[%s2303_s0 + $0x150] sm:$0xff] }
  0x7e   :  { %467 = vmatprep.mubr.f32.mxu1 %v98_v29  ;;  %741 = vmatprep.mubr.f32.mxu0 %v1258_v20 }
  0x7f   :  { %1144 = vmatprep.subr.bf16.mxu1 %v1762_v42  ;;  %v66_v42 = vld [vmem:[%s2303_s0 + $0x160] sm:$0xff] }
  0x80   :  { %468 = vmatmul.mubr.f32.gmra.mrb[30].mxu1 %v97_v16 }
  0x81   :  { %971 = vmatmul.mubr.msk.f32.gmra.mrb[14].mxu0 %vm264_vm0, %v61_v23  ;;  %1160 = vmatpush1.bf16.msra.mxu1 %v1777_v53  ;;  %v69_v53 = vld [vmem:[%s2303_s0 + $0x178] sm:$0xff] }
  0x82   :  { %586 = vmatprep.mubr.f32.mxu1 %v65_v31  ;;  %747 = vmatprep.mubr.f32.mxu0 %v1258_v20 }
  0x84   :  { %587 = vmatmul.mubr.f32.vlgmr.msra.gmra.mrb[16].mxu1 %v64_v36 }
  0x85   :  { %972 = vmatmul.mubr.msk.f32.gmra.mrb[16].mxu0 %vm264_vm0, %v66_v42  ;;  %592 = vmatprep.mubr.f32.mxu1 %v70_v34 }
  0x86   :  { %753 = vmatprep.mubr.f32.mxu0 %v1258_v20 }
  0x88   :  { %593 = vmatmul.mubr.f32.gmra.mrb[18].mxu1 %v69_v53 }
  0x89   :  { %973 = vmatmul.mubr.msk.f32.gmra.mrb[18].mxu0 %vm264_vm0, %v71_v35  ;;  %598 = vmatprep.mubr.f32.mxu1 %v75_v25 }
  0x8a   :  { %759 = vmatprep.mubr.f32.mxu0 %v1258_v20 }
  0x8c   :  { %599 = vmatmul.mubr.f32.gmra.mrb[20].mxu1 %v74_v37 }
  0x8d   :  { %974 = vmatmul.mubr.msk.f32.gmra.mrb[20].mxu0 %vm264_vm0, %v76_v39  ;;  %604 = vmatprep.mubr.f32.mxu1 %v80_v40 }
  0x8e   :  { %765 = vmatprep.mubr.f32.mxu0 %v1258_v20 }
  0x90   :  { %605 = vmatmul.mubr.f32.gmra.mrb[22].mxu1 %v79_v45 }
  0x91   :  { %975 = vmatmul.mubr.msk.f32.gmra.mrb[22].mxu0 %vm264_vm0, %v81_v30  ;;  %610 = vmatprep.mubr.f32.mxu1 %v85_v46 }
  0x92   :  { %771 = vmatprep.mubr.f32.mxu0 %v1258_v20 }
  0x94   :  { %611 = vmatmul.mubr.f32.gmra.mrb[24].mxu1 %v84_v48 }
  0x95   :  { %976 = vmatmul.mubr.msk.f32.gmra.mrb[24].mxu0 %vm264_vm0, %v86_v49  ;;  %616 = vmatprep.mubr.f32.mxu1 %v90_v52 }
  0x96   :  { %777 = vmatprep.mubr.f32.mxu0 %v1258_v20 }
  0x98   :  { %617 = vmatmul.mubr.f32.gmra.mrb[26].mxu1 %v89_v38 }
  0x99   :  { %977 = vmatmul.mubr.msk.f32.gmra.mrb[26].mxu0 %vm264_vm0, %v91_v54  ;;  %622 = vmatprep.mubr.f32.mxu1 %v95_v57 }
  0x9a   :  { %783 = vmatprep.mubr.f32.mxu0 %v1258_v20 }
  0x9c   :  { %623 = vmatmul.mubr.f32.gmra.mrb[28].mxu1 %v94_v58 }
  0x9d   :  { %978 = vmatmul.mubr.msk.f32.gmra.mrb[28].mxu0 %vm264_vm0, %v96_v59  ;;  %628 = vmatprep.mubr.f32.mxu1 %v100_v43 }
  0x9e   :  { %789 = vmatprep.mubr.f32.mxu0 %v1258_v20  ;;  %v252_v20 = vld [vmem:[%s2305_s2] sm:$0x3] }
  0x9f   :  { %v2153_v41 = vrot.slane %v252_v20, %v256_v18  ;;  %v2157_v21 = vrot.slane %v252_v20, %v260_v33 }
  0xa0   :  { %629 = vmatmul.mubr.f32.gmra.mrb[30].mxu1 %v99_v62 }
  0xa1   :  { %979 = vmatmul.mubr.msk.f32.gmra.mrb[30].mxu0 %vm264_vm0, %v101_v0 }
 0x117   :  { %v379_v51 = vpop.f32.mrb[0].mxu1 }
 0x118   :  { %v381_v2 = vpop.f32.mrb[1].mxu1  ;;  %v380_v22 = vadd.f32 %v379_v51, %v2153_v41 }
 0x119   :  { %v382_v6 = vadd.f32 %v381_v2, %v2157_v21 }
 0x11b   :  { %v385_v5 = vpop.f32.mrb[2].mxu1 }
 0x11c   :  { %v387_v56 = vpop.f32.mrb[3].mxu1  ;;  %v386_v50 = vadd.f32 %v385_v5, %v2153_v41 }
 0x11d   :  { %v388_v60 = vadd.f32 %v387_v56, %v2157_v21 }
 0x11f   :  { %v391_v8 = vpop.f32.mrb[4].mxu1 }
 0x120   :  { %v393_v63 = vpop.f32.mrb[5].mxu1  ;;  %v392_v34 = vadd.f32 %v391_v8, %v2153_v41 }
 0x121   :  { %v394_v35 = vadd.f32 %v393_v63, %v2157_v21 }
 0x123   :  { %v397_v9 = vpop.f32.mrb[6].mxu1 }
 0x124   :  { %v399_v7 = vpop.f32.mrb[7].mxu1  ;;  %v398_v49 = vadd.f32 %v397_v9, %v2153_v41 }
 0x125   :  { %v400_v38 = vadd.f32 %v399_v7, %v2157_v21 }
 0x127   :  { %v403_v10 = vpop.f32.mrb[8].mxu1 }
 0x128   :  { %v405_v11 = vpop.f32.mrb[9].mxu1  ;;  %v404_v51 = vadd.f32 %v403_v10, %v2153_v41 }
 0x129   :  { %v406_v5 = vadd.f32 %v405_v11, %v2157_v21 }
 0x12b   :  { %v2142_v15 = vpop.f32.mrb[10].mxu1 }
 0x12c   :  { %v2144_v19 = vpop.f32.mrb[11].mxu1  ;;  %v410_v20 = vadd.f32 %v2142_v15, %v2153_v41 }
 0x12d   :  { %v412_v10 = vadd.f32 %v2144_v19, %v2157_v21 }
 0x12f   :  { %v2146_v27 = vpop.f32.mrb[12].mxu1 }
 0x130   :  { %v2151_v12 = vpop.f32.mrb[13].mxu1 }
 0x131   :  { %v418_v15 = vadd.f32 %v2151_v12, %v2157_v21 }
 0x133   :  { %v2155_v47 = vpop.f32.mrb[14].mxu1 }
 0x134   :  { %v2159_v55 = vpop.f32.mrb[15].mxu1 }
 0x138   :  { %v701_v14 = vpop.f32.mrb[0].mxu0 }
 0x139   :  { %v1162_v26 = vadd.f32 %v701_v14, %v380_v22  ;;  %v703_v24 = vpop.f32.mrb[1].mxu0 }
 0x13a   :  { %v1164_v28 = vadd.f32 %v703_v24, %v382_v6 }
 0x13b   :  { %v796_v17 = vmax.f32 %v1162_v26, 0.0 }
 0x13c   :  { %v797_v3 = vmax.f32 %v1164_v28, 0.0  ;;  %v707_v29 = vpop.f32.mrb[2].mxu0 }
 0x13d   :  { %v1166_v16 = vadd.f32 %v707_v29, %v386_v50  ;;  %v709_v23 = vpop.f32.mrb[3].mxu0  ;;  %v840_v31 = vmul.f32 %v2166_v32, %v796_v17  ;;  %v416_v50 = vadd.f32 %v2146_v27, %v2153_v41  ;;  %v424_v27 = vadd.f32 %v2159_v55, %v2157_v21 }
 0x13e   :  { %v1168_v36 = vadd.f32 %v709_v23, %v388_v60  ;;  %v841_v42 = vmul.f32 %v2168_v44, %v797_v3 }
 0x13f   :  { %v798_v53 = vmax.f32 %v1166_v16, 0.0 }
 0x140   :  { %v799_v25 = vmax.f32 %v1168_v36, 0.0  ;;  %v713_v37 = vpop.f32.mrb[4].mxu0  ;;  %v872_v39 = vadd.f32 %v841_v42, %v840_v31  ;;  %v422_v42 = vadd.f32 %v2155_v47, %v2153_v41 }
 0x141   :  { %v842_v40 = vmul.f32 %v2166_v32, %v798_v53  ;;  %v1170_v45 = vadd.f32 %v713_v37, %v392_v34  ;;  %v715_v30 = vpop.f32.mrb[5].mxu0 }
 0x142   :  { %v843_v46 = vmul.f32 %v2168_v44, %v799_v25  ;;  %v1172_v48 = vadd.f32 %v715_v30, %v394_v35  ;;  %873 = vadd.xlane.f32.xlu0 %v872_v39 }
 0x143   :  { %v800_v52 = vmax.f32 %v1170_v45, 0.0 }
 0x144   :  { %v801_v54 = vmax.f32 %v1172_v48, 0.0  ;;  %v719_v57 = vpop.f32.mrb[6].mxu0  ;;  %v875_v58 = vadd.f32 %v843_v46, %v842_v40 }
 0x145   :  { %v1174_v59 = vadd.f32 %v719_v57, %v398_v49  ;;  %v721_v43 = vpop.f32.mrb[7].mxu0  ;;  %v844_v62 = vmul.f32 %v2166_v32, %v800_v52 }
 0x146   :  { %v1176_v0 = vadd.f32 %v721_v43, %v400_v38  ;;  %876 = vadd.xlane.f32.xlu0 %v875_v58  ;;  %v845_v1 = vmul.f32 %v2168_v44, %v801_v54 }
 0x147   :  { %v802_v2 = vmax.f32 %v1174_v59, 0.0 }
 0x148   :  { %v803_v56 = vmax.f32 %v1176_v0, 0.0  ;;  %v725_v8 = vpop.f32.mrb[8].mxu0  ;;  %v878_v63 = vadd.f32 %v845_v1, %v844_v62 }
 0x149   :  { %v846_v9 = vmul.f32 %v2166_v32, %v802_v2  ;;  %v1178_v7 = vadd.f32 %v725_v8, %v404_v51  ;;  %v727_v4 = vpop.f32.mrb[9].mxu0 }
 0x14a   :  { %v847_v13 = vmul.f32 %v2168_v44, %v803_v56  ;;  %v1180_v18 = vadd.f32 %v727_v4, %v406_v5  ;;  %879 = vadd.xlane.f32.xlu1 %v878_v63 }
 0x14b   :  { %v804_v33 = vmax.f32 %v1178_v7, 0.0 }
 0x14c   :  { %v805_v61 = vmax.f32 %v1180_v18, 0.0  ;;  %v731_v11 = vpop.f32.mrb[10].mxu0  ;;  %v881_v22 = vadd.f32 %v847_v13, %v846_v9 }
 0x14d   :  { %v848_v6 = vmul.f32 %v2166_v32, %v804_v33  ;;  %v1182_v14 = vadd.f32 %v731_v11, %v410_v20  ;;  %v733_v26 = vpop.f32.mrb[11].mxu0 }
 0x14e   :  { %v849_v24 = vmul.f32 %v2168_v44, %v805_v61  ;;  %v1184_v28 = vadd.f32 %v733_v26, %v412_v10  ;;  %882 = vadd.xlane.f32.xlu1 %v881_v22 }
 0x14f   :  { %v806_v17 = vmax.f32 %v1182_v14, 0.0 }
 0x150   :  { %v807_v60 = vmax.f32 %v1184_v28, 0.0  ;;  %v737_v19 = vpop.f32.mrb[12].mxu0  ;;  %v884_v3 = vadd.f32 %v849_v24, %v848_v6 }
 0x151   :  { %v850_v29 = vmul.f32 %v2166_v32, %v806_v17  ;;  %v1186_v16 = vadd.f32 %v737_v19, %v416_v50  ;;  %v739_v23 = vpop.f32.mrb[13].mxu0 }
 0x152   :  { %v851_v31 = vmul.f32 %v2168_v44, %v807_v60  ;;  %v1188_v36 = vadd.f32 %v739_v23, %v418_v15  ;;  %885 = vadd.xlane.f32.xlu0 %v884_v3 }
 0x153   :  { %v808_v34 = vmax.f32 %v1186_v16, 0.0 }
 0x154   :  { %v809_v53 = vmax.f32 %v1188_v36, 0.0  ;;  %v743_v12 = vpop.f32.mrb[14].mxu0  ;;  %v887_v35 = vadd.f32 %v851_v31, %v850_v29 }
 0x155   :  { %v852_v25 = vmul.f32 %v2166_v32, %v808_v34  ;;  %v1190_v37 = vadd.f32 %v743_v12, %v422_v42  ;;  %v745_v39 = vpop.f32.mrb[15].mxu0 }
 0x156   :  { %v853_v40 = vmul.f32 %v2168_v44, %v809_v53  ;;  %v1192_v45 = vadd.f32 %v745_v39, %v424_v27  ;;  %888 = vadd.xlane.f32.xlu1 %v887_v35 }
 0x157   :  { %v810_v30 = vmax.f32 %v1190_v37, 0.0  ;;  %v588_v46 = vpop.f32.mrb[16].mxu1 }
 0x158   :  { %v811_v48 = vmax.f32 %v1192_v45, 0.0  ;;  %v1193_v47 = vadd.f32 %v588_v46, %v2153_v41  ;;  %v590_v49 = vpop.f32.mrb[17].mxu1  ;;  %v749_v52 = vpop.f32.mrb[16].mxu0  ;;  %v890_v38 = vadd.f32 %v853_v40, %v852_v25 }
 0x159   :  { %v854_v55 = vmul.f32 %v2166_v32, %v810_v30  ;;  %v1195_v54 = vadd.f32 %v590_v49, %v2157_v21  ;;  %v751_v57 = vpop.f32.mrb[17].mxu0 }
 0x15a   :  { %v855_v58 = vmul.f32 %v2168_v44, %v811_v48  ;;  %v1194_v59 = vadd.f32 %v1193_v47, %v749_v52  ;;  %891 = vadd.xlane.f32.xlu0 %v890_v38 }
 0x15b   :  { %v1196_v43 = vadd.f32 %v1195_v54, %v751_v57  ;;  %v594_v62 = vpop.f32.mrb[18].mxu1 }
 0x15c   :  { %v812_v0 = vmax.f32 %v1194_v59, 0.0  ;;  %v1197_v1 = vadd.f32 %v594_v62, %v2153_v41  ;;  %v596_v51 = vpop.f32.mrb[19].mxu1  ;;  %v755_v2 = vpop.f32.mrb[18].mxu0  ;;  %v893_v5 = vadd.f32 %v855_v58, %v854_v55 }
 0x15d   :  { %v813_v56 = vmax.f32 %v1196_v43, 0.0  ;;  %v1199_v8 = vadd.f32 %v596_v51, %v2157_v21  ;;  %v757_v63 = vpop.f32.mrb[19].mxu0 }
 0x15e   :  { %v856_v9 = vmul.f32 %v2166_v32, %v812_v0  ;;  %v1198_v7 = vadd.f32 %v1197_v1, %v755_v2  ;;  %894 = vadd.xlane.f32.xlu1 %v893_v5 }
 0x15f   :  { %v857_v4 = vmul.f32 %v2168_v44, %v813_v56  ;;  %v1200_v13 = vadd.f32 %v1199_v8, %v757_v63  ;;  %v600_v18 = vpop.f32.mrb[20].mxu1 }
 0x160   :  { %v814_v20 = vmax.f32 %v1198_v7, 0.0  ;;  %v1201_v33 = vadd.f32 %v600_v18, %v2153_v41  ;;  %v602_v10 = vpop.f32.mrb[21].mxu1  ;;  %v761_v61 = vpop.f32.mrb[20].mxu0 }
 0x161   :  { %v815_v11 = vmax.f32 %v1200_v13, 0.0  ;;  %v1203_v22 = vadd.f32 %v602_v10, %v2157_v21  ;;  %v763_v6 = vpop.f32.mrb[21].mxu0  ;;  %v896_v14 = vadd.f32 %v857_v4, %v856_v9 }
 0x162   :  { %v858_v26 = vmul.f32 %v2166_v32, %v814_v20  ;;  %v1202_v24 = vadd.f32 %v1201_v33, %v761_v61 }
 0x163   :  { %v859_v28 = vmul.f32 %v2168_v44, %v815_v11  ;;  %v1204_v50 = vadd.f32 %v1203_v22, %v763_v6  ;;  %v606_v17 = vpop.f32.mrb[22].mxu1  ;;  %897 = vadd.xlane.f32.xlu0 %v896_v14 }
 0x164   :  { %v816_v15 = vmax.f32 %v1202_v24, 0.0  ;;  %v1205_v60 = vadd.f32 %v606_v17, %v2153_v41  ;;  %v608_v19 = vpop.f32.mrb[23].mxu1  ;;  %v767_v3 = vpop.f32.mrb[22].mxu0 }
 0x165   :  { %v817_v29 = vmax.f32 %v1204_v50, 0.0  ;;  %v1207_v16 = vadd.f32 %v608_v19, %v2157_v21  ;;  %v769_v23 = vpop.f32.mrb[23].mxu0  ;;  %v899_v31 = vadd.f32 %v859_v28, %v858_v26 }
 0x166   :  { %v860_v36 = vmul.f32 %v2166_v32, %v816_v15  ;;  %v1206_v42 = vadd.f32 %v1205_v60, %v767_v3 }
 0x167   :  { %v861_v34 = vmul.f32 %v2168_v44, %v817_v29  ;;  %v1208_v27 = vadd.f32 %v1207_v16, %v769_v23  ;;  %v612_v53 = vpop.f32.mrb[24].mxu1  ;;  %900 = vadd.xlane.f32.xlu1 %v899_v31 }
 0x168   :  { %v818_v12 = vmax.f32 %v1206_v42, 0.0  ;;  %v1209_v35 = vadd.f32 %v612_v53, %v2153_v41  ;;  %v614_v25 = vpop.f32.mrb[25].mxu1  ;;  %v773_v37 = vpop.f32.mrb[24].mxu0 }
 0x169   :  { %v819_v39 = vmax.f32 %v1208_v27, 0.0  ;;  %v1211_v40 = vadd.f32 %v614_v25, %v2157_v21  ;;  %v775_v45 = vpop.f32.mrb[25].mxu0  ;;  %v902_v30 = vadd.f32 %v861_v34, %v860_v36 }
 0x16a   :  { %v862_v46 = vmul.f32 %v2166_v32, %v818_v12  ;;  %v1210_v48 = vadd.f32 %v1209_v35, %v773_v37 }
 0x16b   :  { %v863_v47 = vmul.f32 %v2168_v44, %v819_v39  ;;  %v1212_v49 = vadd.f32 %v1211_v40, %v775_v45  ;;  %v618_v52 = vpop.f32.mrb[26].mxu1  ;;  %903 = vadd.xlane.f32.xlu0 %v902_v30 }
 0x16c   :  { %v820_v38 = vmax.f32 %v1210_v48, 0.0  ;;  %v1213_v55 = vadd.f32 %v618_v52, %v2153_v41  ;;  %v620_v54 = vpop.f32.mrb[27].mxu1  ;;  %v779_v57 = vpop.f32.mrb[26].mxu0 }
 0x16d   :  { %v821_v58 = vmax.f32 %v1212_v49, 0.0  ;;  %v1215_v59 = vadd.f32 %v620_v54, %v2157_v21  ;;  %v781_v43 = vpop.f32.mrb[27].mxu0  ;;  %v905_v62 = vadd.f32 %v863_v47, %v862_v46 }
 0x16e   :  { %v864_v0 = vmul.f32 %v2166_v32, %v820_v38  ;;  %v1214_v1 = vadd.f32 %v1213_v55, %v779_v57 }
 0x16f   :  { %v865_v51 = vmul.f32 %v2168_v44, %v821_v58  ;;  %v1216_v2 = vadd.f32 %v1215_v59, %v781_v43  ;;  %v624_v5 = vpop.f32.mrb[28].mxu1  ;;  %906 = vadd.xlane.f32.xlu1 %v905_v62 }
 0x170   :  { %v822_v56 = vmax.f32 %v1214_v1, 0.0  ;;  %v1217_v8 = vadd.f32 %v624_v5, %v2153_v41  ;;  %v626_v63 = vpop.f32.mrb[29].mxu1  ;;  %v785_v9 = vpop.f32.mrb[28].mxu0 }
 0x171   :  { %v823_v7 = vmax.f32 %v1216_v2, 0.0  ;;  %v1219_v4 = vadd.f32 %v626_v63, %v2157_v21  ;;  %v787_v13 = vpop.f32.mrb[29].mxu0  ;;  %v908_v18 = vadd.f32 %v865_v51, %v864_v0 }
 0x172   :  { %v866_v20 = vmul.f32 %v2166_v32, %v822_v56  ;;  %v1218_v33 = vadd.f32 %v1217_v8, %v785_v9 }
 0x173   :  { %v867_v10 = vmul.f32 %v2168_v44, %v823_v7  ;;  %v1220_v61 = vadd.f32 %v1219_v4, %v787_v13  ;;  %v630_v11 = vpop.f32.mrb[30].mxu1  ;;  %909 = vadd.xlane.f32.xlu0 %v908_v18 }
 0x174   :  { %v824_v22 = vmax.f32 %v1218_v33, 0.0  ;;  %v1221_v6 = vadd.f32 %v630_v11, %v2153_v41  ;;  %v632_v14 = vpop.f32.mrb[31].mxu1  ;;  %v791_v26 = vpop.f32.mrb[30].mxu0 }
 0x175   :  { %v825_v24 = vmax.f32 %v1220_v61, 0.0  ;;  %v1223_v28 = vadd.f32 %v632_v14, %v2157_v21  ;;  %v793_v50 = vpop.f32.mrb[31].mxu0  ;;  %v911_v17 = vadd.f32 %v867_v10, %v866_v20  ;;  %v980_v21 = vld [vmem:[#allocation2] ss:$0 sm:$0xff] }
 0x176   :  { %v868_v15 = vmul.f32 %v2166_v32, %v824_v22  ;;  %v1222_v60 = vadd.f32 %v1221_v6, %v791_v26 }
 0x177   :  { %v869_v19 = vmul.f32 %v2168_v44, %v825_v24  ;;  %v1224_v3 = vadd.f32 %v1223_v28, %v793_v50  ;;  %912 = vadd.xlane.f32.xlu1 %v911_v17 }
 0x178   :  { %v826_v29 = vmax.f32 %v1222_v60, 0.0 }
 0x179   :  { %v827_v16 = vmax.f32 %v1224_v3, 0.0  ;;  %v914_v23 = vadd.f32 %v869_v19, %v868_v15 }
 0x17a   :  { %v870_v31 = vmul.f32 %v2166_v32, %v826_v29 }
 0x17b   :  { %v871_v41 = vmul.f32 %v2168_v44, %v827_v16  ;;  %915 = vadd.xlane.f32.xlu0 %v914_v23 }
 0x17d   :  { %v917_v36 = vadd.f32 %v871_v41, %v870_v31 }
 0x17f   :  { %918 = vadd.xlane.f32.xlu1 %v917_v36 }
 0x1cf   :  { %v874_v42 = vpop.xlane.xlu0 %873 }
 0x1d0   :  { %v927_v34 = vadd.f32 %v980_v21, %v874_v42 }
 0x1d2   :  { %944 = vst.msk [vmem:[%s2307_s5] sm:$0xff] %vm943_vm1, %v927_v34 }
 0x1d3   :  { %v877_v27 = vpop.xlane.xlu0 %876 }
 0x1d4   :  { %v928_v53 = vadd.f32 %v980_v21, %v877_v27 }
 0x1d6   :  { %945 = vst.msk [vmem:[%s2307_s5 + $0x8] sm:$0xff] %vm943_vm1, %v928_v53 }
 0x1d7   :  { %v880_v32 = vpop.xlane.xlu1 %879 }
 0x1d8   :  { %v929_v44 = vadd.f32 %v980_v21, %v880_v32 }
 0x1da   :  { %946 = vst.msk [vmem:[%s2307_s5 + $0x10] sm:$0xff] %vm943_vm1, %v929_v44 }
 0x1db   :  { %v883_v12 = vpop.xlane.xlu1 %882 }
 0x1dc   :  { %v930_v35 = vadd.f32 %v980_v21, %v883_v12 }
 0x1de   :  { %947 = vst.msk [vmem:[%s2307_s5 + $0x18] sm:$0xff] %vm943_vm1, %v930_v35 }
 0x1df   :  { %v886_v25 = vpop.xlane.xlu0 %885 }
 0x1e0   :  { %v931_v37 = vadd.f32 %v980_v21, %v886_v25 }
 0x1e2   :  { %948 = vst.msk [vmem:[%s2307_s5 + $0x20] sm:$0xff] %vm943_vm1, %v931_v37 }
 0x1e3   :  { %v889_v39 = vpop.xlane.xlu1 %888 }
 0x1e4   :  { %v932_v40 = vadd.f32 %v980_v21, %v889_v39 }
 0x1e6   :  { %949 = vst.msk [vmem:[%s2307_s5 + $0x28] sm:$0xff] %vm943_vm1, %v932_v40 }
 0x1e7   :  { %v892_v45 = vpop.xlane.xlu0 %891 }
 0x1e8   :  { %v933_v30 = vadd.f32 %v980_v21, %v892_v45 }
 0x1ea   :  { %950 = vst.msk [vmem:[%s2307_s5 + $0x30] sm:$0xff] %vm943_vm1, %v933_v30 }
 0x1eb   :  { %v895_v46 = vpop.xlane.xlu1 %894 }
 0x1ec   :  { %v934_v48 = vadd.f32 %v980_v21, %v895_v46 }
 0x1ee   :  { %951 = vst.msk [vmem:[%s2307_s5 + $0x38] sm:$0xff] %vm943_vm1, %v934_v48 }
 0x1f0   :  { %v898_v47 = vpop.xlane.xlu0 %897 }
 0x1f1   :  { %v935_v49 = vadd.f32 %v980_v21, %v898_v47 }
 0x1f3   :  { %952 = vst.msk [vmem:[%s2307_s5 + $0x40] sm:$0xff] %vm943_vm1, %v935_v49 }
 0x1f4   :  { %v901_v52 = vpop.xlane.xlu1 %900 }
 0x1f5   :  { %v936_v38 = vadd.f32 %v980_v21, %v901_v52 }
 0x1f7   :  { %953 = vst.msk [vmem:[%s2307_s5 + $0x48] sm:$0xff] %vm943_vm1, %v936_v38 }
 0x1f8   :  { %v904_v55 = vpop.xlane.xlu0 %903 }
 0x1f9   :  { %v937_v54 = vadd.f32 %v980_v21, %v904_v55 }
 0x1fb   :  { %954 = vst.msk [vmem:[%s2307_s5 + $0x50] sm:$0xff] %vm943_vm1, %v937_v54 }
 0x1fc   :  { %v907_v57 = vpop.xlane.xlu1 %906 }
 0x1fd   :  { %v938_v58 = vadd.f32 %v980_v21, %v907_v57 }
 0x1ff   :  { %955 = vst.msk [vmem:[%s2307_s5 + $0x58] sm:$0xff] %vm943_vm1, %v938_v58 }
 0x200   :  { %v910_v59 = vpop.xlane.xlu0 %909 }
 0x201   :  { %v939_v43 = vadd.f32 %v980_v21, %v910_v59 }
 0x203   :  { %956 = vst.msk [vmem:[%s2307_s5 + $0x60] sm:$0xff] %vm943_vm1, %v939_v43 }
 0x204   :  { %v913_v62 = vpop.xlane.xlu1 %912 }
 0x205   :  { %v940_v0 = vadd.f32 %v980_v21, %v913_v62 }
 0x207   :  { %957 = vst.msk [vmem:[%s2307_s5 + $0x68] sm:$0xff] %vm943_vm1, %v940_v0 }
 0x208   :  { %v916_v1 = vpop.xlane.xlu0 %915 }
 0x209   :  { %v941_v51 = vadd.f32 %v980_v21, %v916_v1 }
 0x20b   :  { %958 = vst.msk [vmem:[%s2307_s5 + $0x70] sm:$0xff] %vm943_vm1, %v941_v51 }
 0x20c   :  { %v919_v2 = vpop.xlane.xlu1 %918 }
 0x20d   :  { %v942_v5 = vadd.f32 %v980_v21, %v919_v2 }
 0x20f   :  { %959 = vst.msk [vmem:[%s2307_s5 + $0x78] sm:$0xff] %vm943_vm1, %v942_v5 }

</bundles_post_ra>
